<compile_context>
chip_gen: v7x
topology: tpu7x:2x2x1
jax: 0.10.0
libtpu: 0.0.40
codegen_flags: <defaults>
</compile_context>

<pallas_src>
import functools

import jax
import jax.numpy as jnp
from jax import lax
from jax.experimental import pallas as pl
from jax.experimental.pallas import tpu as pltpu

LANE = 128            # lane width
ACC_SUB = 8           # sublanes of the per-lane accumulator vreg
MAX_TILE_ROWS = 2048  # 1 MiB per f32 input tile
NUM_SHARDS = 2        # leading "parallel" grid axis (2 TCs on v7x)
MIN_MASKED_ROWS = 64  # below this, padding copy is cheaper/safer than masking


def _round_up(a, b):
    return ((a + b - 1) // b) * b


def _make_kernel(tile_rows, steps, rows, need_mask, need_l1, need_ssim):
    """Accumulate six per-lane partial sums into the resident output block."""

    def kernel(x_ref, y_ref, out_ref):
        i = pl.program_id(1)

        @pl.when(i == 0)
        def _init():
            out_ref[...] = jnp.zeros_like(out_ref)

        # Native dtype in HBM; upcast in-register.
        x = x_ref[...].astype(jnp.float32)
        y = y_ref[...].astype(jnp.float32)

        if need_mask:
            # Zero out rows past the true row count (last partial block and
            # any clamped/fully-out-of-range shard blocks contribute 0).
            row_start = (pl.program_id(0) * steps + i) * tile_rows
            row_ids = row_start + lax.broadcasted_iota(
                jnp.int32, (tile_rows, 1), 0)
            valid = row_ids < rows
            x = jnp.where(valid, x, 0.0)
            y = jnp.where(valid, y, 0.0)

        x = x.reshape(tile_rows // ACC_SUB, ACC_SUB, LANE)
        y = y.reshape(tile_rows // ACC_SUB, ACC_SUB, LANE)

        # Leading-axis sums are pure VPU vreg adds (no cross-lane XLU traffic
        # in the steady state); cross-lane reduction is deferred to the wrapper.
        if need_l1:
            out_ref[0, 0, :, :] += jnp.sum(jnp.abs(x - y), axis=0)
        if need_ssim:
            out_ref[0, 1, :, :] += jnp.sum(x, axis=0)
            out_ref[0, 2, :, :] += jnp.sum(y, axis=0)
            out_ref[0, 3, :, :] += jnp.sum(x * x, axis=0)
            out_ref[0, 4, :, :] += jnp.sum(y * y, axis=0)
            out_ref[0, 5, :, :] += jnp.sum(x * y, axis=0)

    return kernel


@functools.partial(
    jax.jit,
    static_argnames=(
        "average", "SSIM_c1", "SSIM_c2", "SSIM_c3",
        "arfa", "beta", "gamma", "k_L1", "k_SSIM",
    ),
)
def l1_ssim_loss(x, target, *, average=True, SSIM_c1=0.2, SSIM_c2=0.2,
                 SSIM_c3=0.1, arfa=1.0, beta=1.0, gamma=1.0,
                 k_L1=1.0, k_SSIM=1.0):
    n = x.size
    x_flat = x.reshape(-1)
    y_flat = target.reshape(-1)

    # ---- tiling (all Python ints: shapes are static under jit) ----
    rows = -(-n // LANE)
    rows_per_shard = -(-rows // NUM_SHARDS)
    # Round to 32 rows so the block is sublane-legal for f32/bf16/8-bit dtypes.
    tile_rows = min(MAX_TILE_ROWS, _round_up(max(rows_per_shard, 1), 32))
    steps = -(-rows_per_shard // tile_rows)
    coverage = NUM_SHARDS * steps * tile_rows   # rows spanned by the grid

    aligned = (n % LANE == 0)
    if (not aligned) or rows < MIN_MASKED_ROWS:
        # Fallback: zero-pad to exact grid coverage (copy; only for tiny or
        # non-128-multiple inputs, where the copy is cheap / unavoidable).
        pad = coverage * LANE - n
        if pad:
            x_flat = jnp.pad(x_flat, (0, pad))
            y_flat = jnp.pad(y_flat, (0, pad))
        rows_arr = coverage
        need_mask = False
    else:
        # Zero-copy path: feed the tensor as-is; partial/overhanging blocks are
        # masked in-kernel, so no full-size padded materialization in HBM.
        rows_arr = rows
        need_mask = coverage != rows

    x2 = x_flat.reshape(rows_arr, LANE)
    y2 = y_flat.reshape(rows_arr, LANE)

    need_l1 = float(k_L1) != 0.0
    need_ssim = float(k_SSIM) != 0.0
    kernel = _make_kernel(tile_rows, steps, rows_arr, need_mask,
                          need_l1, need_ssim)

    if need_mask:
        # Clamp so no block starts fully past the array (kernel mask zeroes
        # any re-read data, so a clamped block contributes exactly 0).
        max_block = (rows_arr - 1) // tile_rows
        in_map = lambda p, i: (jnp.minimum(p * steps + i, max_block), 0)
    else:
        in_map = lambda p, i: (p * steps + i, 0)

    partials = pl.pallas_call(
        kernel,
        out_shape=jax.ShapeDtypeStruct((NUM_SHARDS, 6, ACC_SUB, LANE),
                                       jnp.float32),
        grid_spec=pltpu.PrefetchScalarGridSpec(
            num_scalar_prefetch=0,
            grid=(NUM_SHARDS, steps),
            in_specs=[
                pl.BlockSpec((tile_rows, LANE), in_map),
                pl.BlockSpec((tile_rows, LANE), in_map),
            ],
            out_specs=pl.BlockSpec((1, 6, ACC_SUB, LANE),
                                   lambda p, i: (p, 0, 0, 0)),
        ),
        compiler_params=pltpu.CompilerParams(
            dimension_semantics=("parallel", "arbitrary")),
    )(x2, y2)

    # ---- finalize: six scalars + SSIM math (O(1), done once) ----
    sums = jnp.sum(partials, axis=(0, 2, 3))  # (6,)
    s_abs, s_x, s_y, s_xx, s_yy, s_xy = (sums[j] for j in range(6))

    nf = jnp.float32(n)
    l1 = s_abs / nf if average else s_abs

    mu_x = s_x / nf
    mu_y = s_y / nf
    var_x = jnp.maximum(s_xx / nf - mu_x * mu_x, 0.0)
    var_y = jnp.maximum(s_yy / nf - mu_y * mu_y, 0.0)
    cov = s_xy / nf - mu_x * mu_y
    sig_x = jnp.sqrt(var_x)
    sig_y = jnp.sqrt(var_y)

    c1, c2, c3 = float(SSIM_c1), float(SSIM_c2), float(SSIM_c3)
    l = (2.0 * mu_x * mu_y + c1) / (mu_x * mu_x + mu_y * mu_y + c1)
    c = (2.0 * sig_x * sig_y + c2) / (var_x + var_y + c2)
    s = (cov + c3) / (sig_x * sig_y + c3)

    def _pow(base, e):
        e = float(e)
        return base if e == 1.0 else base ** e   # skip exp/log path for defaults

    ssim_loss = 1.0 - _pow(l, arfa) * _pow(c, beta) * _pow(s, gamma)

    out = jnp.float32(0.0)
    if need_l1:
        out = out + l1 * float(k_L1)
    if need_ssim:
        out = out + ssim_loss * float(k_SSIM)
    return out


def _reference(x, y, *, c1=0.2, c2=0.2, c3=0.1, a=1.0, b=1.0, g=1.0,
               k_l1=1.0, k_ssim=1.0):
    x = x.astype(jnp.float32).ravel()
    y = y.astype(jnp.float32).ravel()
    l1 = jnp.mean(jnp.abs(x - y))
    mu_x, mu_y = jnp.mean(x), jnp.mean(y)
    var_x = jnp.mean(x * x) - mu_x ** 2
    var_y = jnp.mean(y * y) - mu_y ** 2
    cov = jnp.mean(x * y) - mu_x * mu_y
    sig_x, sig_y = jnp.sqrt(var_x), jnp.sqrt(var_y)
    l = (2 * mu_x * mu_y + c1) / (mu_x ** 2 + mu_y ** 2 + c1)
    c = (2 * sig_x * sig_y + c2) / (var_x + var_y + c2)
    s = (cov + c3) / (sig_x * sig_y + c3)
    ssim_loss = 1.0 - (l ** a) * (c ** b) * (s ** g)
    return l1 * k_l1 + ssim_loss * k_ssim


if __name__ == "__main__":
    key = jax.random.PRNGKey(0)

    # Shapes chosen to exercise all three wrapper paths:
    #   (2,4,16,16)  -> tiny, 128-aligned  -> padded-fallback path
    #   (4,25,128)   -> aligned, rows=100  -> zero-copy masked path
    #   (3,5,7)      -> not 128-aligned    -> lane-pad path
    #   (8,8,64,128) -> aligned, exact grid coverage -> pure streaming path
    shapes = [(2, 4, 16, 16), (4, 25, 128), (3, 5, 7), (8, 8, 64, 128)]

    result = None
    for shp in shapes:
        key, k1, k2 = jax.random.split(key, 3)
        xi = jax.random.uniform(k1, shp, dtype=jnp.float32)
        ti = jax.random.uniform(k2, shp, dtype=jnp.float32)
        out = l1_ssim_loss(xi, ti)
        jax.block_until_ready(out)
        ref = _reference(xi, ti)
        assert jnp.allclose(out, ref, rtol=1e-4, atol=1e-4), (shp, out, ref)
        result = out

    jax.block_until_ready(result)
    print("KERNEL_OK")
</pallas_src>

<mosaic_0001>
module attributes {stable_mosaic.version = 11 : i64} {
  func.func @kernel(%arg0: i32, %arg1: i32, %arg2: memref<32x128xf32, #tpu.memory_space<vmem>>, %arg3: memref<32x128xf32, #tpu.memory_space<vmem>>, %arg4: memref<1x6x8x128xf32, #tpu.memory_space<vmem>>) attributes {dimension_semantics = [#tpu.dimension_semantics<parallel>, #tpu.dimension_semantics<arbitrary>], iteration_bounds = array<i64: 2, 1>, scalar_prefetch = 0 : i64, scratch_operands = 0 : i64, tpu.core_type = #tpu.core_type<tc>, window_params = [{transform_indices = @transform_0, window_bounds = array<i64: 32, 128>}, {transform_indices = @transform_1, window_bounds = array<i64: 32, 128>}, {transform_indices = @transform_2, window_bounds = array<i64: 1, 6, 8, 128>}]} {
    %c0_i32 = arith.constant 0 : i32
    %0 = arith.cmpi eq, %arg1, %c0_i32 : i32
    %1 = arith.extui %0 : i1 to i32
    %c0_i32_0 = arith.constant 0 : i32
    %2 = arith.cmpi ne, %1, %c0_i32_0 : i32
    scf.if %2 {
      %cst_52 = arith.constant 0.000000e+00 : f32
      %54 = vector.broadcast %cst_52 : f32 to vector<1x6x8x128xf32>
      %c0_53 = arith.constant 0 : index
      %c0_54 = arith.constant 0 : index
      %c0_55 = arith.constant 0 : index
      %c0_56 = arith.constant 0 : index
      %55 = vector.load %arg4[%c0_53, %c0_54, %c0_55, %c0_56] : memref<1x6x8x128xf32, #tpu.memory_space<vmem>>, vector<1x6x8x128xf32>
      tpu.vector_store %arg4[%c0_53, %c0_54, %c0_55, %c0_56], %54 {strides = array<i32>} : memref<1x6x8x128xf32, #tpu.memory_space<vmem>>, vector<1x6x8x128xf32>,
    } else {
    }
    %c0 = arith.constant 0 : index
    %c0_1 = arith.constant 0 : index
    %3 = vector.load %arg2[%c0, %c0_1] : memref<32x128xf32, #tpu.memory_space<vmem>>, vector<32x128xf32>
    %c0_2 = arith.constant 0 : index
    %c0_3 = arith.constant 0 : index
    %4 = vector.load %arg3[%c0_2, %c0_3] : memref<32x128xf32, #tpu.memory_space<vmem>>, vector<32x128xf32>
    %5 = vector.shape_cast %3 : vector<32x128xf32> to vector<4x8x128xf32>
    %6 = vector.shape_cast %4 : vector<32x128xf32> to vector<4x8x128xf32>
    %c0_4 = arith.constant 0 : index
    %c0_5 = arith.constant 0 : index
    %c0_6 = arith.constant 0 : index
    %c0_7 = arith.constant 0 : index
    %7 = vector.load %arg4[%c0_4, %c0_5, %c0_6, %c0_7] : memref<1x6x8x128xf32, #tpu.memory_space<vmem>>, vector<1x1x8x128xf32>
    %8 = vector.shape_cast %7 : vector<1x1x8x128xf32> to vector<8x128xf32>
    %9 = arith.subf %5, %6 : vector<4x8x128xf32>
    %10 = math.absf %9 : vector<4x8x128xf32>
    %cst = arith.constant dense<0.000000e+00> : vector<8x128xf32>
    %11 = vector.multi_reduction <add>, %10, %cst [0] : vector<4x8x128xf32> to vector<8x128xf32>
    %12 = arith.addf %8, %11 : vector<8x128xf32>
    %c0_8 = arith.constant 0 : index
    %c0_9 = arith.constant 0 : index
    %c0_10 = arith.constant 0 : index
    %c0_11 = arith.constant 0 : index
    %13 = vector.load %arg4[%c0_8, %c0_9, %c0_10, %c0_11] : memref<1x6x8x128xf32, #tpu.memory_space<vmem>>, vector<1x1x8x128xf32>
    %14 = vector.shape_cast %13 : vector<1x1x8x128xf32> to vector<8x128xf32>
    %15 = vector.shape_cast %12 : vector<8x128xf32> to vector<1x1x8x128xf32>
    tpu.vector_store %arg4[%c0_8, %c0_9, %c0_10, %c0_11], %15 {strides = array<i32>} : memref<1x6x8x128xf32, #tpu.memory_space<vmem>>, vector<1x1x8x128xf32>,
    %c0_12 = arith.constant 0 : index
    %c1 = arith.constant 1 : index
    %c0_13 = arith.constant 0 : index
    %c0_14 = arith.constant 0 : index
    %16 = vector.load %arg4[%c0_12, %c1, %c0_13, %c0_14] : memref<1x6x8x128xf32, #tpu.memory_space<vmem>>, vector<1x1x8x128xf32>
    %17 = vector.shape_cast %16 : vector<1x1x8x128xf32> to vector<8x128xf32>
    %cst_15 = arith.constant dense<0.000000e+00> : vector<8x128xf32>
    %18 = vector.multi_reduction <add>, %5, %cst_15 [0] : vector<4x8x128xf32> to vector<8x128xf32>
    %19 = arith.addf %17, %18 : vector<8x128xf32>
    %c0_16 = arith.constant 0 : index
    %c1_17 = arith.constant 1 : index
    %c0_18 = arith.constant 0 : index
    %c0_19 = arith.constant 0 : index
    %20 = vector.load %arg4[%c0_16, %c1_17, %c0_18, %c0_19] : memref<1x6x8x128xf32, #tpu.memory_space<vmem>>, vector<1x1x8x128xf32>
    %21 = vector.shape_cast %20 : vector<1x1x8x128xf32> to vector<8x128xf32>
    %22 = vector.shape_cast %19 : vector<8x128xf32> to vector<1x1x8x128xf32>
    tpu.vector_store %arg4[%c0_16, %c1_17, %c0_18, %c0_19], %22 {strides = array<i32>} : memref<1x6x8x128xf32, #tpu.memory_space<vmem>>, vector<1x1x8x128xf32>,
    %c0_20 = arith.constant 0 : index
    %c2 = arith.constant 2 : index
    %c0_21 = arith.constant 0 : index
    %c0_22 = arith.constant 0 : index
    %23 = vector.load %arg4[%c0_20, %c2, %c0_21, %c0_22] : memref<1x6x8x128xf32, #tpu.memory_space<vmem>>, vector<1x1x8x128xf32>
    %24 = vector.shape_cast %23 : vector<1x1x8x128xf32> to vector<8x128xf32>
    %cst_23 = arith.constant dense<0.000000e+00> : vector<8x128xf32>
    %25 = vector.multi_reduction <add>, %6, %cst_23 [0] : vector<4x8x128xf32> to vector<8x128xf32>
    %26 = arith.addf %24, %25 : vector<8x128xf32>
    %c0_24 = arith.constant 0 : index
    %c2_25 = arith.constant 2 : index
    %c0_26 = arith.constant 0 : index
    %c0_27 = arith.constant 0 : index
    %27 = vector.load %arg4[%c0_24, %c2_25, %c0_26, %c0_27] : memref<1x6x8x128xf32, #tpu.memory_space<vmem>>, vector<1x1x8x128xf32>
    %28 = vector.shape_cast %27 : vector<1x1x8x128xf32> to vector<8x128xf32>
    %29 = vector.shape_cast %26 : vector<8x128xf32> to vector<1x1x8x128xf32>
    tpu.vector_store %arg4[%c0_24, %c2_25, %c0_26, %c0_27], %29 {strides = array<i32>} : memref<1x6x8x128xf32, #tpu.memory_space<vmem>>, vector<1x1x8x128xf32>,
    %c0_28 = arith.constant 0 : index
    %c3 = arith.constant 3 : index
    %c0_29 = arith.constant 0 : index
    %c0_30 = arith.constant 0 : index
    %30 = vector.load %arg4[%c0_28, %c3, %c0_29, %c0_30] : memref<1x6x8x128xf32, #tpu.memory_space<vmem>>, vector<1x1x8x128xf32>
    %31 = vector.shape_cast %30 : vector<1x1x8x128xf32> to vector<8x128xf32>
    %32 = arith.mulf %5, %5 : vector<4x8x128xf32>
    %cst_31 = arith.constant dense<0.000000e+00> : vector<8x128xf32>
    %33 = vector.multi_reduction <add>, %32, %cst_31 [0] : vector<4x8x128xf32> to vector<8x128xf32>
    %34 = arith.addf %31, %33 : vector<8x128xf32>
    %c0_32 = arith.constant 0 : index
    %c3_33 = arith.constant 3 : index
    %c0_34 = arith.constant 0 : index
    %c0_35 = arith.constant 0 : index
    %35 = vector.load %arg4[%c0_32, %c3_33, %c0_34, %c0_35] : memref<1x6x8x128xf32, #tpu.memory_space<vmem>>, vector<1x1x8x128xf32>
    %36 = vector.shape_cast %35 : vector<1x1x8x128xf32> to vector<8x128xf32>
    %37 = vector.shape_cast %34 : vector<8x128xf32> to vector<1x1x8x128xf32>
    tpu.vector_store %arg4[%c0_32, %c3_33, %c0_34, %c0_35], %37 {strides = array<i32>} : memref<1x6x8x128xf32, #tpu.memory_space<vmem>>, vector<1x1x8x128xf32>,
    %c0_36 = arith.constant 0 : index
    %c4 = arith.constant 4 : index
    %c0_37 = arith.constant 0 : index
    %c0_38 = arith.constant 0 : index
    %38 = vector.load %arg4[%c0_36, %c4, %c0_37, %c0_38] : memref<1x6x8x128xf32, #tpu.memory_space<vmem>>, vector<1x1x8x128xf32>
    %39 = vector.shape_cast %38 : vector<1x1x8x128xf32> to vector<8x128xf32>
    %40 = arith.mulf %6, %6 : vector<4x8x128xf32>
    %cst_39 = arith.constant dense<0.000000e+00> : vector<8x128xf32>
    %41 = vector.multi_reduction <add>, %40, %cst_39 [0] : vector<4x8x128xf32> to vector<8x128xf32>
    %42 = arith.addf %39, %41 : vector<8x128xf32>
    %c0_40 = arith.constant 0 : index
    %c4_41 = arith.constant 4 : index
    %c0_42 = arith.constant 0 : index
    %c0_43 = arith.constant 0 : index
    %43 = vector.load %arg4[%c0_40, %c4_41, %c0_42, %c0_43] : memref<1x6x8x128xf32, #tpu.memory_space<vmem>>, vector<1x1x8x128xf32>
    %44 = vector.shape_cast %43 : vector<1x1x8x128xf32> to vector<8x128xf32>
    %45 = vector.shape_cast %42 : vector<8x128xf32> to vector<1x1x8x128xf32>
    tpu.vector_store %arg4[%c0_40, %c4_41, %c0_42, %c0_43], %45 {strides = array<i32>} : memref<1x6x8x128xf32, #tpu.memory_space<vmem>>, vector<1x1x8x128xf32>,
    %c0_44 = arith.constant 0 : index
    %c5 = arith.constant 5 : index
    %c0_45 = arith.constant 0 : index
    %c0_46 = arith.constant 0 : index
    %46 = vector.load %arg4[%c0_44, %c5, %c0_45, %c0_46] : memref<1x6x8x128xf32, #tpu.memory_space<vmem>>, vector<1x1x8x128xf32>
    %47 = vector.shape_cast %46 : vector<1x1x8x128xf32> to vector<8x128xf32>
    %48 = arith.mulf %5, %6 : vector<4x8x128xf32>
    %cst_47 = arith.constant dense<0.000000e+00> : vector<8x128xf32>
    %49 = vector.multi_reduction <add>, %48, %cst_47 [0] : vector<4x8x128xf32> to vector<8x128xf32>
    %50 = arith.addf %47, %49 : vector<8x128xf32>
    %c0_48 = arith.constant 0 : index
    %c5_49 = arith.constant 5 : index
    %c0_50 = arith.constant 0 : index
    %c0_51 = arith.constant 0 : index
    %51 = vector.load %arg4[%c0_48, %c5_49, %c0_50, %c0_51] : memref<1x6x8x128xf32, #tpu.memory_space<vmem>>, vector<1x1x8x128xf32>
    %52 = vector.shape_cast %51 : vector<1x1x8x128xf32> to vector<8x128xf32>
    %53 = vector.shape_cast %50 : vector<8x128xf32> to vector<1x1x8x128xf32>
    tpu.vector_store %arg4[%c0_48, %c5_49, %c0_50, %c0_51], %53 {strides = array<i32>} : memref<1x6x8x128xf32, #tpu.memory_space<vmem>>, vector<1x1x8x128xf32>,
    return
  }
  func.func @transform_0(%arg0: i32, %arg1: i32) -> (i32, i32) {
    %c1_i32 = arith.constant 1 : i32
    %0 = arith.muli %arg0, %c1_i32 : i32
    %1 = arith.addi %0, %arg1 : i32
    %c0_i32 = arith.constant 0 : i32
    %c0_i32_0 = arith.constant 0 : i32
    return %1, %c0_i32 : i32, i32
  }
  func.func @transform_1(%arg0: i32, %arg1: i32) -> (i32, i32) {
    %c1_i32 = arith.constant 1 : i32
    %0 = arith.muli %arg0, %c1_i32 : i32
    %1 = arith.addi %0, %arg1 : i32
    %c0_i32 = arith.constant 0 : i32
    %c0_i32_0 = arith.constant 0 : i32
    return %1, %c0_i32 : i32, i32
  }
  func.func @transform_2(%arg0: i32, %arg1: i32) -> (i32, i32, i32, i32) {
    %c0_i32 = arith.constant 0 : i32
    %c0_i32_0 = arith.constant 0 : i32
    %c0_i32_1 = arith.constant 0 : i32
    %c0_i32_2 = arith.constant 0 : i32
    return %arg0, %c0_i32, %c0_i32_0, %c0_i32_1 : i32, i32, i32, i32
  }
}

</mosaic_0001>

<bundles_post_ra>
// kernel: l1_ssim_loss.1
= control target key start
LH: loop header
LB: loop body
LE: loop exit
PB: predicated region body
PF: predicated region fallthrough
CT: control target
= control target key end

     0   :  { %s435_s9 = smov 0   ;;  %s437_s10 = smov 0   ;;  %s474_s0 = inlined_call_operand.vmem [shape: f32[64,128], index: 0, kind: input, shape index: {}]   ;;  %s475_s1 = inlined_call_operand.vmem [shape: f32[64,128], index: 1, kind: input, shape index: {}]   ;;  %s476_s2 = inlined_call_operand.vmem [shape: f32[2,6,8,128], index: 2, kind: output, shape index: {}]  }
   0x1   :  { %s439_s11 = smov 0  }
   0x2 LB: > { %s24_s12 = sadd.s32 1, %s414_s10  ;;  %p352_p0 = scmp.ge.s32.totalorder %s418_s11, 1  ;;  %s418_s11 = sphi %s439_s11, %s12_s11   ;;  %s414_s10 = sphi %s437_s10, %s478_s10   ;;  %s410_s9 = sphi %s435_s9, %s477_s9  }
   0x3   : > { %p26_p1 = scmp.ge.s32.totalorder %s24_s12, 2  ;;  %p144_p2 = scmp.lt.s32.totalorder %s418_s11, 3 }
   0x5   : > { %s480_s12 = smov (%p26_p1, %s24_s12), 0  ;;  %p145_p3 = pnand %p352_p0, %p144_p2 }
   0x6   : > { %p189_p4 = scmp.lt.s32.totalorder (!%p145_p3), %s410_s9, 1  ;;  %s353_s13 = sshll.u32 (!%p145_p3), %s410_s9, 2 }
   0x7   : > { %148 = sbr.rel (%p145_p3) target bundleno = 33 (0x21), region = 28  ;;  %p175_p5 = scmp.lt.s32.totalorder (!%p145_p3), %s353_s13, 7 }
   0xe   : > { %s482_s13 = smov (!%p175_p5, %s353_s13), 7  ;;  %s484_s9 = smov (!%p189_p4, %s410_s9), 1 }
   0xf   : > { %s354_s14 = sshll.u32 %s482_s13, 3  ;;  %s370_s21 = smul.u32 48, %s484_s9 }
  0x10   : > { %s178_s17 = scalar_lea.vmem %s474_s0, %s354_s14  ;;  %s186_s20 = scalar_lea.vmem %s475_s1, %s354_s14 }
  0x11   : > { %v204_v0 = vld [vmem:[%s178_s17] sm:$0xff]  ;;  %v205_v1 = vld [vmem:[%s178_s17 + $0x8] sm:$0xff]  ;;  %v206_v2 = vld [vmem:[%s178_s17 + $0x10] sm:$0xff]  ;;  %s193_s24 = scalar_lea.vmem %s476_s2, %s370_s21 }
  0x12   : > { %v207_v3 = vld [vmem:[%s178_s17 + $0x18] sm:$0xff]  ;;  %v208_v4 = vld [vmem:[%s186_s20] sm:$0xff]  ;;  %v209_v5 = vld [vmem:[%s186_s20 + $0x8] sm:$0xff]  ;;  %v228_v6 = vadd.f32 %v205_v1, %v204_v0  ;;  %v242_v7 = vmul.f32 %v204_v0, %v204_v0  ;;  %v243_v8 = vmul.f32 %v205_v1, %v205_v1  ;;  %v244_v9 = vmul.f32 %v206_v2, %v206_v2 }
  0x13   : > { %v210_v10 = vld [vmem:[%s186_s20 + $0x10] sm:$0xff]  ;;  %v211_v11 = vld [vmem:[%s186_s20 + $0x18] sm:$0xff]  ;;  %v213_v12 = vsub.f32 %v204_v0, %v208_v4  ;;  %v214_v13 = vsub.f32 %v205_v1, %v209_v5  ;;  %v235_v14 = vadd.f32 %v209_v5, %v208_v4  ;;  %v245_v15 = vmul.f32 %v207_v3, %v207_v3 }
  0x14   : > { %v215_v16 = vsub.f32 %v206_v2, %v210_v10  ;;  %v216_v17 = vsub.f32 %v207_v3, %v211_v11  ;;  %v229_v18 = vadd.f32 %v228_v6, %v206_v2  ;;  %v246_v19 = vadd.f32 %v243_v8, %v242_v7 }
  0x15   : > { %v217_v20 = vand.u32 2147483647, %v213_v12  ;;  %v218_v21 = vand.u32 2147483647, %v214_v13  ;;  %v236_v22 = vadd.f32 %v235_v14, %v210_v10  ;;  %v253_v23 = vmul.f32 %v208_v4, %v208_v4 }
  0x16   : > { %v219_v24 = vand.u32 2147483647, %v215_v16  ;;  %v220_v25 = vand.u32 2147483647, %v216_v17  ;;  %v230_v26 = vadd.f32 %v229_v18, %v207_v3  ;;  %v247_v27 = vadd.f32 %v246_v19, %v244_v9 }
  0x17   : > { %v221_v28 = vadd.f32 %v218_v21, %v217_v20  ;;  %v237_v29 = vadd.f32 %v236_v22, %v211_v11  ;;  %v254_v30 = vmul.f32 %v209_v5, %v209_v5  ;;  %v255_v31 = vmul.f32 %v210_v10, %v210_v10 }
  0x18   : > { %v248_v32 = vadd.f32 %v247_v27, %v245_v15  ;;  %v256_v33 = vmul.f32 %v211_v11, %v211_v11  ;;  %v264_v34 = vmul.f32 %v208_v4, %v204_v0  ;;  %v265_v37 = vmul.f32 %v209_v5, %v205_v1  ;;  %359 = vst [vmem:[%s193_s24 + $0x8] sm:$0xff] %v230_v26 }
  0x19   : > { %v222_v35 = vadd.f32 %v221_v28, %v219_v24  ;;  %v257_v36 = vadd.f32 %v254_v30, %v253_v23  ;;  %v266_v38 = vmul.f32 %v210_v10, %v206_v2  ;;  %361 = vst [vmem:[%s193_s24 + $0x10] sm:$0xff] %v237_v29  ;;  %v267_v41 = vmul.f32 %v211_v11, %v207_v3 }
  0x1a   : > { %v268_v42 = vadd.f32 %v265_v37, %v264_v34  ;;  %363 = vst [vmem:[%s193_s24 + $0x18] sm:$0xff] %v248_v32 }
  0x1b   : > { %v223_v39 = vadd.f32 %v222_v35, %v220_v25  ;;  %v258_v40 = vadd.f32 %v257_v36, %v255_v31 }
  0x1c   : > { %v269_v44 = vadd.f32 %v268_v42, %v266_v38 }
  0x1d   : > { %v259_v43 = vadd.f32 %v258_v40, %v256_v33  ;;  %225 = vst [vmem:[%s193_s24] sm:$0xff] %v223_v39 }
  0x1e   : > { %v270_v45 = vadd.f32 %v269_v44, %v267_v41 }
  0x1f   : > { %365 = vst [vmem:[%s193_s24 + $0x20] sm:$0xff] %v259_v43 }
  0x20   : > { %367 = vst [vmem:[%s193_s24 + $0x28] sm:$0xff] %v270_v45 }
  0x21 PF: > { %s12_s11 = sadd.s32 1, %s418_s11   ;;  %s477_s9 = smov %s414_s10 }
  0x22   : > { %p9_p6 = scmp.ge.s32.totalorder %s12_s11, 4   ;;  %s478_s10 = smov %s480_s12 }
  0x24   :  { %11 = sbr.rel (!%p9_p6) target bundleno = 2 (0x2), region = 70 }

</bundles_post_ra>
